<compile_context>
chip_gen: v7x
topology: tpu7x:2x2x1
jax: 0.10.0
libtpu: 0.0.40
codegen_flags: <defaults>
</compile_context>

<pallas_src>
import jax
import jax.numpy as jnp
from jax.experimental import pallas as pl
from jax.experimental.pallas import tpu as pltpu


# ---------------------------------------------------------------------------
# sech^2 Pallas kernel:  x (M, N)  ->  sech^2(x)  of shape (M, N)   (no transpose)
# ---------------------------------------------------------------------------
def _sech2_kernel(x_ref, o_ref):
    x = x_ref[...].astype(jnp.float32)
    t = jnp.tanh(x)                              # single EUP op
    o_ref[...] = ((1.0 - t) * (1.0 + t)).astype(o_ref.dtype)   # cheap VPU ops, lane-dense store


def _pick_tile(dim, preferred):
    """Largest multiple-of-128 divisor of `dim` (dim is a multiple of 128)
    that is <= preferred (clamped to >= 128)."""
    t = min(preferred, dim)
    t = max(128, (t // 128) * 128)
    while dim % t:
        t -= 128
    return t


def sech2_pallas(x, *, out_dtype=None, preferred_tile=1024):
    """Elementwise sech^2(x) via Pallas.  x: (M, N) -> (M, N)."""
    M, N = x.shape
    out_dtype = x.dtype if out_dtype is None else out_dtype

    # Pad to 128-multiples so every tile is (8,128)-aligned and unmasked.
    Mp = ((M + 127) // 128) * 128
    Np = ((N + 127) // 128) * 128
    xp = x if (Mp == M and Np == N) else jnp.pad(x, ((0, Mp - M), (0, Np - N)))

    tm = _pick_tile(Mp, preferred_tile)
    tn = _pick_tile(Np, preferred_tile)
    # Megacore (v7x): make sure a "parallel" axis has >= 2 blocks when possible.
    if (Mp // tm) * (Np // tn) == 1:
        if Mp >= Np and Mp >= 256:
            tm = _pick_tile(Mp, Mp // 2)
        elif Np >= 256:
            tn = _pick_tile(Np, Np // 2)

    out = pl.pallas_call(
        _sech2_kernel,
        out_shape=jax.ShapeDtypeStruct((Mp, Np), out_dtype),
        grid_spec=pltpu.PrefetchScalarGridSpec(
            num_scalar_prefetch=0,
            grid=(Mp // tm, Np // tn),
            in_specs=[pl.BlockSpec((tm, tn), lambda i, j: (i, j))],
            out_specs=pl.BlockSpec((tm, tn), lambda i, j: (i, j)),
        ),
        compiler_params=pltpu.CompilerParams(
            dimension_semantics=("parallel", "parallel"),
            vmem_limit_bytes=32 * 1024 * 1024,
        ),
    )(xp)

    if Mp != M or Np != N:
        out = out[:M, :N]
    return out


_PALLAS_MIN_ELEMENTS = 1 << 20   # below this, fixed launch/DMA overhead dominates


def sech2(x, *, use_pallas=None, out_dtype=None):
    """Dispatcher: Pallas kernel for large activations, fused jnp for small."""
    if use_pallas is None:
        use_pallas = x.size >= _PALLAS_MIN_ELEMENTS
    if use_pallas:
        return sech2_pallas(x, out_dtype=out_dtype)
    t = jnp.tanh(x)
    y = (1.0 - t) * (1.0 + t)
    return y.astype(x.dtype if out_dtype is None else out_dtype)


def derivtanh(x, **kw):
    """DerivTanh module semantics: x (M, N) -> sech^2(x).T of shape (N, M).
    The transpose is pure layout plumbing done outside the kernel."""
    return sech2(x, **kw).T


# ---------------------------------------------------------------------------
# DerivNet forward (Linear/Tanh alternating stack ending in Linear).
# Linear layers and the derivative-chain contractions are plain JAX (MXU work
# XLA handles well); the activation-derivative map uses the Pallas kernel.
# ---------------------------------------------------------------------------
# TODO(synk): only Tanh activations are implemented (DerivReLU branch of the
# original module is not exercised here).
def derivnet_forward(x, weights, biases, *, use_pallas=None):
    """JAX port of DerivNet.forward for a [Linear, Tanh, ..., Linear] stack.

    x:       (nx, dim_x)
    weights: list of (out_i, in_i) matrices (torch Linear convention)
    biases:  list of (out_i,) vectors
    Returns (y, dydx) with dydx a list of length dim_x, each (nx, dim_y).
    """
    nx, dim_x = x.shape
    num_linear = len(weights)

    # forward pass
    h = []
    a = x
    for i in range(num_linear):
        hi = a @ weights[i].T + biases[i]
        h.append(hi)
        if i < num_linear - 1:
            a = jnp.tanh(hi)
    y = h[-1]

    # untransposed activation derivatives: dzdh_u[i] has shape (nx, hidden_i)
    dzdh_u = [sech2(h[i], use_pallas=use_pallas) for i in range(num_linear - 1)]

    # Batched derivative propagation over all input dims k at once.
    # D[n, o, k] = d h_layer[n, o] / d x[n, k]
    if num_linear == 1:
        D = jnp.broadcast_to(weights[0][None, :, :], (nx, weights[0].shape[0], dim_x))
    else:
        # layer 0: W0[:, k] broadcast over samples, times sech^2(h0)
        D = jnp.einsum('nh,hk->nhk', dzdh_u[0], weights[0])
        for i in range(1, num_linear):
            D = jnp.einsum('oh,nhk->nok', weights[i], D, precision="highest")
            if i < num_linear - 1:
                D = dzdh_u[i][:, :, None] * D

    dydx = [D[:, :, k] for k in range(dim_x)]
    return y, dydx


if __name__ == "__main__":
    key = jax.random.PRNGKey(0)
    k1, k2, k3, k4, k5 = jax.random.split(key, 5)

    # DerivNet: Linear(dim_x, hidden) -> Tanh -> Linear(hidden, dim_y)
    nx, dim_x, hidden, dim_y = 128, 4, 256, 1
    x = jax.random.normal(k1, (nx, dim_x), dtype=jnp.float32)
    w0 = jax.random.normal(k2, (hidden, dim_x), dtype=jnp.float32) * 0.5
    b0 = jax.random.normal(k3, (hidden,), dtype=jnp.float32) * 0.1
    w1 = jax.random.normal(k4, (dim_y, hidden), dtype=jnp.float32) * 0.5
    b1 = jnp.zeros((dim_y,), dtype=jnp.float32)

    # --- pure-JAX reference (mirrors the PyTorch module exactly) ---
    h0 = x @ w0.T + b0
    z0 = jnp.tanh(h0)
    y_ref = z0 @ w1.T + b1
    sech2_ref = 4.0 / jnp.square(jnp.exp(-h0) + jnp.exp(h0))          # (nx, hidden)
    dzdh_ref_T = sech2_ref.T                                          # DerivTanh output (hidden, nx)

    # 1) kernel-only check (untransposed sech^2, Pallas path forced)
    s_kernel = jax.block_until_ready(sech2_pallas(h0))
    assert s_kernel.shape == (nx, hidden)
    assert jnp.allclose(s_kernel, sech2_ref, atol=1e-5, rtol=1e-5)

    # DerivTanh module semantics (transpose handled outside the kernel)
    dz_kernel = jax.block_until_ready(derivtanh(h0, use_pallas=True))
    assert dz_kernel.shape == (hidden, nx)
    assert jnp.allclose(dz_kernel, dzdh_ref_T, atol=1e-5, rtol=1e-5)

    # 2) unaligned-shape check (exercises the pad -> kernel -> slice path)
    xu = jax.random.normal(k5, (130, 260), dtype=jnp.float32)
    su = jax.block_until_ready(sech2_pallas(xu))
    su_ref = 4.0 / jnp.square(jnp.exp(-xu) + jnp.exp(xu))
    assert su.shape == (130, 260)
    assert jnp.allclose(su, su_ref, atol=1e-5, rtol=1e-5)

    # 3) full DerivNet forward check (Pallas kernel forced on)
    y, dydx = derivnet_forward(x, [w0, w1], [b0, b1], use_pallas=True)
    y = jax.block_until_ready(y)
    dydx = [jax.block_until_ready(d) for d in dydx]

    assert y.shape == (nx, dim_y)
    assert jnp.allclose(y, y_ref, atol=1e-5, rtol=1e-5)
    assert len(dydx) == dim_x
    for k in range(dim_x):
        tmp = jnp.broadcast_to(w0[:, k][:, None], (hidden, nx))
        tmp = dzdh_ref_T * tmp
        tmp = jnp.matmul(w1, tmp, precision="highest")
        ref_k = tmp.T
        assert dydx[k].shape == (nx, dim_y)
        assert jnp.allclose(dydx[k], ref_k, atol=1e-4, rtol=1e-4)

    # 4) default dispatch (small activations -> fused jnp fallback) still matches
    y2, dydx2 = derivnet_forward(x, [w0, w1], [b0, b1])
    jax.block_until_ready(y2)
    assert jnp.allclose(y2, y_ref, atol=1e-5, rtol=1e-5)
    for k in range(dim_x):
        assert jnp.allclose(dydx2[k], dydx[k], atol=1e-4, rtol=1e-4)

    print("KERNEL_OK")
</pallas_src>

<mosaic_0001>
module attributes {stable_mosaic.version = 11 : i64} {
  func.func @_sech2_kernel(%arg0: i32, %arg1: i32, %arg2: memref<128x128xf32, #tpu.memory_space<vmem>>, %arg3: memref<128x128xf32, #tpu.memory_space<vmem>>) attributes {dimension_semantics = [#tpu.dimension_semantics<parallel>, #tpu.dimension_semantics<parallel>], iteration_bounds = array<i64: 1, 2>, scalar_prefetch = 0 : i64, scratch_operands = 0 : i64, tpu.core_type = #tpu.core_type<tc>, window_params = [{transform_indices = @transform_0, window_bounds = array<i64: 128, 128>}, {transform_indices = @transform_1, window_bounds = array<i64: 128, 128>}]} {
    %c0 = arith.constant 0 : index
    %c0_0 = arith.constant 0 : index
    %0 = vector.load %arg2[%c0, %c0_0] : memref<128x128xf32, #tpu.memory_space<vmem>>, vector<128x128xf32>
    %1 = math.tanh %0 : vector<128x128xf32>
    %cst = arith.constant 1.000000e+00 : f32
    %2 = vector.broadcast %cst : f32 to vector<128x128xf32>
    %3 = arith.subf %2, %1 : vector<128x128xf32>
    %cst_1 = arith.constant 1.000000e+00 : f32
    %4 = vector.broadcast %cst_1 : f32 to vector<128x128xf32>
    %5 = arith.addf %4, %1 : vector<128x128xf32>
    %6 = arith.mulf %3, %5 : vector<128x128xf32>
    %c0_2 = arith.constant 0 : index
    %c0_3 = arith.constant 0 : index
    %7 = vector.load %arg3[%c0_2, %c0_3] : memref<128x128xf32, #tpu.memory_space<vmem>>, vector<128x128xf32>
    tpu.vector_store %arg3[%c0_2, %c0_3], %6 {strides = array<i32>} : memref<128x128xf32, #tpu.memory_space<vmem>>, vector<128x128xf32>,
    return
  }
  func.func @transform_0(%arg0: i32, %arg1: i32) -> (i32, i32) {
    %c0_i32 = arith.constant 0 : i32
    return %arg0, %arg1 : i32, i32
  }
  func.func @transform_1(%arg0: i32, %arg1: i32) -> (i32, i32) {
    %c0_i32 = arith.constant 0 : i32
    return %arg0, %arg1 : i32, i32
  }
}

</mosaic_0001>

<bundles_post_ra>
// kernel: tpu_custom_call.1
= control target key start
LH: loop header
LB: loop body
LE: loop exit
PB: predicated region body
PF: predicated region fallthrough
CT: control target
= control target key end

     0   :  { %6 = vsyncpa [#allocation3], 0  ;;  %s811_s0 = inlined_call_operand.hbm [shape: f32[128,256], index: 0, kind: input, shape index: {}]   ;;  %s812_s1 = inlined_call_operand.hbm [shape: f32[128,256], index: 1, kind: output, shape index: {}]  }
   0x1   :  { %8 = vsyncpa [#allocation3 + $0x1], 0 }
   0x2   :  { %9 = vsyncpa [#allocation4], 0 }
   0x3   :  { %11 = vsyncpa [#allocation4 + $0x1], 0  ;;  %s597_s6 = smov 0   ;;  %s599_s7 = smov 0  }
   0x4   :  { %s601_s8 = smov 0   ;;  %s603_s9 = smov 0  }
   0x5   :  { %s605_s10 = smov 0   ;;  %s607_s11 = smov 0  }
   0x6 LB: > { %s352_s12 = sadd.s32 4294967295, %s577_s11   ;;  %s353_s13 = sadd.s32 4294967294, %s577_s11   ;;  %s577_s11 = sphi %s607_s11, %s17_s11   ;;  %s573_s10 = sphi %s605_s10, %s826_s10   ;;  %s569_s9 = sphi %s603_s9, %s825_s9   ;;  %s565_s8 = sphi %s601_s8, %s824_s8   ;;  %s561_s7 = sphi %s599_s7, %s823_s7   ;;  %s557_s6 = sphi %s597_s6, %s822_s6  }
   0x7   : > { %s26_s14 = sadd.s32 1, %s573_s10  ;;  %s38_s15 = sadd.s32 1, %s565_s8 }
   0x8   : > { %p27_p0 = scmp.ge.s32.totalorder %s26_s14, 2  ;;  %p45_p1 = scmp.ne.s32.totalorder %s565_s8, %s561_s7 }
   0x9   : > { %p46_p2 = scmp.eq.s32.totalorder %s577_s11, 0  ;;  %p51_p3 = scmp.ne.s32.totalorder %s561_s7, %s557_s6 }
   0xa   : > { %s828_s14 = smov (%p27_p0, %s26_s14), 0  ;;  %p52_p5 = scmp.eq.s32.totalorder %s352_s12, 0 }
   0xb   : > { %p638_p4 = por %p46_p2, %p45_p1  ;;  %s34_s17 = ssub.s32 %s573_s10, %s828_s14 }
   0xc   : > { %p77_p6 = scmp.eq.s32.totalorder %s352_s12, 1  ;;  %p36_p7 = scmp.eq.s32.totalorder %s34_s17, 0 }
   0xd   : > { %p644_p8 = por %p52_p5, %p51_p3  ;;  %p83_p10 = scmp.eq.s32.totalorder %s353_s13, 1 }
   0xe   : > { %p648_p9 = por %p77_p6, %p45_p1  ;;  %p377_p13 = scmp.lt.s32.totalorder %s577_s11, 2 }
   0xf   : > { %s653_s20 = scalar_select %p36_p7, %s565_s8, %s38_s15  }
  0x10   : > { %s816_s19 = scalar_select %p648_p9, 1, 0 }
  0x11   : > { %p655_p11 = por %p83_p10, %p51_p3  ;;  %s103_s22 = sand.u32 1, %s565_s8  }
  0x12   : > { %s356_s23 = sshll.u32 %s103_s22, 7  ;;  %s357_s24 = sshll.u32 %s573_s10, 7 }
  0x13   : > { %s817_s21 = scalar_select %p655_p11, 1, 0 }
  0x14   : > { %s666_s27 = scalar_lea.hbm %s811_s0, %s357_s24  ;;  %s107_s28 = scalar_lea.vmem [#allocation2], %s356_s23 }
  0x15   : > { %s116_s29 = sshll.u32 %s107_s28, 4  ;;  %p672_p0 = pnand %p377_p13, %p638_p4  ;;  %s668_s29 = int_to_ptr.vmem [resolvable:$true] %s116_s29 }
  0x16   : > { %s676_s2 = scalar_lea.sflag [#allocation3], %s103_s22  ;;  %s465_s3 = scalar_lea.hbm %s666_s27, 2048 }
  0x17   : > { %p466_p1 = scmp.ne.s32.totalorder %s666_s27, %s465_s3  ;;  %p467_p2 = pneg %p672_p0 }
  0x18   : > { %s470_s12 = scalar_lea.hbm %s811_s0, 4096  ;;  %p471_p4 = scmp.lt.u32.totalorder %s666_s27, %s811_s0 }
  0x19   : > { %p468_p3 = pnand %p467_p2, %p466_p1  ;;  %p472_p6 = scmp.lt.u32.totalorder %s470_s12, %s465_s3 }
  0x1a   : > { %p474_p10 = scmp.lt.u32.totalorder %s465_s3, %s666_s27 }
  0x1b   : > { %p469_p5 = pneg %p468_p3  ;;  %p473_p7 = por %p472_p6, %p471_p4 }
  0x1d   : > { %p475_p13 = por %p474_p10, %p473_p7 }
  0x1f   : > { %p476_p12 = pnand %p475_p13, %p469_p5 }
  0x21   : > { %479 = shalt.err (!%p476_p12)
}
  0x22   : > { %s480_s16 = scalar_lea.vmem %s668_s29, 2048  ;;  %s579_s17 = smov [#allocation2]  }
  0x23   : > { %p481_p1 = scmp.ne.s32.totalorder %s668_s29, %s480_s16  ;;  %s485_s22 = sshll.u32 %s579_s17, 4  ;;  %s486_s22 = int_to_ptr.vmem [resolvable:$false] %s485_s22 }
  0x24   : > { %s487_s23 = scalar_lea.vmem %s486_s22, 4096  ;;  %p488_p9 = scmp.lt.s32.totalorder %s668_s29, %s486_s22 }
  0x25   : > { %p483_p3 = pnand %p481_p1, %p467_p2  ;;  %p489_p4 = scmp.lt.s32.totalorder %s487_s23, %s480_s16 }
  0x27   : > { %p484_p11 = pneg %p483_p3  ;;  %p490_p6 = por %p489_p4, %p488_p9 }
  0x29   : > { %p491_p7 = pnand %p490_p6, %p484_p11 }
  0x2b   : > { %494 = shalt.err (!%p491_p7)
}
  0x2c   : > { %s580_s24 = smov 256   ;;  %s581_s25 = smov 128  }
  0x2d   : > { %s582_s26 = smov 8   ;;  %p358_p12 = scmp.ge.s32.totalorder %s577_s11, 1 }
  0x2e   : > { %372 = dma.hbm_to_vmem [thread:$0]  (!%p672_p0), %s666_s27, 2048, %s668_s29, %s676_s2, %s580_s24, %s581_s25, %s582_s26  }
  0x2f   : > { %p124_p2 = scmp.lt.s32.totalorder %s577_s11, 3 }
  0x31   : > { %p125_p5 = pnand %p358_p12, %p124_p2 }
  0x32   : > { %s707_s28 = sand.u32 (!%p125_p5), 1, %s561_s7  }
  0x33   : > { %128 = sbr.rel (%p125_p5) target bundleno = 106 (0x6a), region = 24  ;;  %s359_s3 = sshll.u32 (!%p125_p5), %s707_s28, 7 }
  0x34   : > { %s131_s4 = scalar_lea.sflag (!%p125_p5), [#allocation3], %s707_s28  ;;  %s713_s5 = scalar_lea.vmem (!%p125_p5), [#allocation2], %s359_s3 }
  0x3a   : > { %548 = dma.done.wait (%p644_p8), %s131_s4, 2048  }
  0x3b   : > { %550 = vsyncadd (%p644_p8), %s131_s4, 4294965248  ;;  %v155_v0 = vld [vmem:[%s713_s5] sm:$0xff]  ;;  %v156_v1 = vld [vmem:[%s713_s5 + $0x8] sm:$0xff]  ;;  %s737_s18 = scalar_lea.vmem [#allocation5], %s359_s3  ;;  %s362_s27 = sshll.u32 %s569_s9, 7 }
  0x3c   : > { %v157_v2 = vld [vmem:[%s713_s5 + $0x10] sm:$0xff]  ;;  %433 = vtanh.f32 %v155_v0  ;;  %v158_v3 = vld [vmem:[%s713_s5 + $0x18] sm:$0xff]  ;;  %v159_v4 = vld [vmem:[%s713_s5 + $0x20] sm:$0xff]  ;;  %s267_s29 = sshll.u32 %s737_s18, 4  ;;  %s756_s2 = scalar_lea.hbm %s812_s1, %s362_s27  ;;  %s759_s29 = int_to_ptr.vmem [resolvable:$true] %s267_s29 }
  0x3d   : > { %435 = vtanh.f32 %v156_v1  ;;  %v160_v5 = vld [vmem:[%s713_s5 + $0x28] sm:$0xff]  ;;  %v161_v6 = vld [vmem:[%s713_s5 + $0x30] sm:$0xff]  ;;  %v162_v7 = vld [vmem:[%s713_s5 + $0x38] sm:$0xff]  ;;  %s252_s12 = scalar_lea.sflag [#allocation4], %s707_s28  ;;  %s495_s13 = scalar_lea.vmem %s759_s29, 2048 }
  0x3e   : > { %437 = vtanh.f32 %v157_v2  ;;  %v163_v8 = vld [vmem:[%s713_s5 + $0x40] sm:$0xff]  ;;  %v164_v9 = vld [vmem:[%s713_s5 + $0x48] sm:$0xff]  ;;  %v165_v10 = vld [vmem:[%s713_s5 + $0x50] sm:$0xff]  ;;  %p496_p8 = scmp.ne.s32.totalorder %s759_s29, %s495_s13  ;;  %p819_p9 = scmp.ne.s32.totalorder %s816_s19, 0 }
  0x3f   : > { %439 = vtanh.f32 %v158_v3  ;;  %v166_v11 = vld [vmem:[%s713_s5 + $0x58] sm:$0xff]  ;;  %v167_v12 = vld [vmem:[%s713_s5 + $0x60] sm:$0xff]  ;;  %v168_v14 = vld [vmem:[%s713_s5 + $0x68] sm:$0xff]  ;;  %s583_s15 = smov [#allocation5]  }
  0x40   : > { %441 = vtanh.f32 %v159_v4  ;;  %v169_v18 = vld [vmem:[%s713_s5 + $0x70] sm:$0xff]  ;;  %v170_v22 = vld [vmem:[%s713_s5 + $0x78] sm:$0xff]  ;;  %p497_p11 = pnand %p496_p8, %p819_p9  ;;  %s499_s16 = sshll.u32 %s583_s15, 4  ;;  %s500_s16 = int_to_ptr.vmem [resolvable:$false] %s499_s16 }
  0x41   : > { %443 = vtanh.f32 %v160_v5  ;;  %s501_s17 = scalar_lea.vmem %s500_s16, 4096  ;;  %p502_p10 = scmp.lt.s32.totalorder %s759_s29, %s500_s16 }
  0x42   : > { %445 = vtanh.f32 %v161_v6  ;;  %p498_p0 = pneg %p497_p11  ;;  %p503_p13 = scmp.lt.s32.totalorder %s501_s17, %s495_s13 }
  0x43   : > { %447 = vtanh.f32 %v162_v7 }
  0x44   : > { %449 = vtanh.f32 %v163_v8  ;;  %p504_p1 = por %p503_p13, %p502_p10 }
  0x45   : > { %451 = vtanh.f32 %v164_v9 }
  0x46   : > { %v434_v13 = vpop.eup %433  ;;  %453 = vtanh.f32 %v165_v10  ;;  %p505_p3 = pnand %p504_p1, %p498_p0 }
  0x47   : > { %v436_v15 = vpop.eup %435  ;;  %v187_v16 = vsub.f32 1.0, %v434_v13  ;;  %v203_v17 = vadd.f32 1.0, %v434_v13  ;;  %455 = vtanh.f32 %v166_v11 }
  0x48   : > { %v438_v19 = vpop.eup %437  ;;  %v188_v20 = vsub.f32 1.0, %v436_v15  ;;  %v204_v21 = vadd.f32 1.0, %v436_v15  ;;  %457 = vtanh.f32 %v167_v12 }
  0x49   : > { %v440_v23 = vpop.eup %439  ;;  %v219_v24 = vmul.f32 %v203_v17, %v187_v16  ;;  %v189_v25 = vsub.f32 1.0, %v438_v19  ;;  %v205_v26 = vadd.f32 1.0, %v438_v19  ;;  %459 = vtanh.f32 %v168_v14 }
  0x4a   : > { %v442_v27 = vpop.eup %441  ;;  %v220_v28 = vmul.f32 %v204_v21, %v188_v20  ;;  %v190_v29 = vsub.f32 1.0, %v440_v23  ;;  %v206_v30 = vadd.f32 1.0, %v440_v23  ;;  %461 = vtanh.f32 %v169_v18 }
  0x4b   : > { %v444_v31 = vpop.eup %443  ;;  %235 = vst [vmem:[%s737_s18] sm:$0xff] %v219_v24  ;;  %v221_v32 = vmul.f32 %v205_v26, %v189_v25  ;;  %v191_v33 = vsub.f32 1.0, %v442_v27  ;;  %v207_v34 = vadd.f32 1.0, %v442_v27  ;;  %463 = vtanh.f32 %v170_v22 }
  0x4c   : > { %v446_v35 = vpop.eup %445  ;;  %236 = vst [vmem:[%s737_s18 + $0x8] sm:$0xff] %v220_v28  ;;  %v222_v36 = vmul.f32 %v206_v30, %v190_v29  ;;  %v192_v37 = vsub.f32 1.0, %v444_v31  ;;  %v208_v38 = vadd.f32 1.0, %v444_v31 }
  0x4d   : > { %v448_v39 = vpop.eup %447  ;;  %237 = vst [vmem:[%s737_s18 + $0x10] sm:$0xff] %v221_v32  ;;  %v223_v40 = vmul.f32 %v207_v34, %v191_v33  ;;  %v193_v41 = vsub.f32 1.0, %v446_v35  ;;  %v209_v42 = vadd.f32 1.0, %v446_v35 }
  0x4e   : > { %v450_v43 = vpop.eup %449  ;;  %238 = vst [vmem:[%s737_s18 + $0x18] sm:$0xff] %v222_v36  ;;  %v224_v44 = vmul.f32 %v208_v38, %v192_v37  ;;  %v194_v45 = vsub.f32 1.0, %v448_v39  ;;  %v210_v46 = vadd.f32 1.0, %v448_v39 }
  0x4f   : > { %v452_v47 = vpop.eup %451  ;;  %239 = vst [vmem:[%s737_s18 + $0x20] sm:$0xff] %v223_v40  ;;  %v225_v48 = vmul.f32 %v209_v42, %v193_v41  ;;  %v195_v49 = vsub.f32 1.0, %v450_v43  ;;  %v211_v50 = vadd.f32 1.0, %v450_v43 }
  0x50   : > { %v454_v51 = vpop.eup %453  ;;  %240 = vst [vmem:[%s737_s18 + $0x28] sm:$0xff] %v224_v44  ;;  %v226_v52 = vmul.f32 %v210_v46, %v194_v45  ;;  %v196_v53 = vsub.f32 1.0, %v452_v47  ;;  %v212_v54 = vadd.f32 1.0, %v452_v47 }
  0x51   : > { %v456_v55 = vpop.eup %455  ;;  %241 = vst [vmem:[%s737_s18 + $0x30] sm:$0xff] %v225_v48  ;;  %v227_v56 = vmul.f32 %v211_v50, %v195_v49  ;;  %v197_v57 = vsub.f32 1.0, %v454_v51  ;;  %v213_v58 = vadd.f32 1.0, %v454_v51 }
  0x52   : > { %v458_v59 = vpop.eup %457  ;;  %242 = vst [vmem:[%s737_s18 + $0x38] sm:$0xff] %v226_v52  ;;  %v228_v60 = vmul.f32 %v212_v54, %v196_v53  ;;  %v198_v61 = vsub.f32 1.0, %v456_v55  ;;  %v214_v62 = vadd.f32 1.0, %v456_v55 }
  0x53   : > { %v460_v63 = vpop.eup %459  ;;  %243 = vst [vmem:[%s737_s18 + $0x40] sm:$0xff] %v227_v56  ;;  %v229_v0 = vmul.f32 %v213_v58, %v197_v57  ;;  %v199_v1 = vsub.f32 1.0, %v458_v59  ;;  %v215_v2 = vadd.f32 1.0, %v458_v59 }
  0x54   : > { %v462_v3 = vpop.eup %461  ;;  %244 = vst [vmem:[%s737_s18 + $0x48] sm:$0xff] %v228_v60  ;;  %v230_v4 = vmul.f32 %v214_v62, %v198_v61  ;;  %v200_v5 = vsub.f32 1.0, %v460_v63  ;;  %v216_v6 = vadd.f32 1.0, %v460_v63 }
  0x55   : > { %v464_v7 = vpop.eup %463  ;;  %245 = vst [vmem:[%s737_s18 + $0x50] sm:$0xff] %v229_v0  ;;  %v231_v8 = vmul.f32 %v215_v2, %v199_v1  ;;  %v201_v9 = vsub.f32 1.0, %v462_v3  ;;  %v217_v10 = vadd.f32 1.0, %v462_v3 }
  0x56   : > { %246 = vst [vmem:[%s737_s18 + $0x58] sm:$0xff] %v230_v4  ;;  %v232_v11 = vmul.f32 %v216_v6, %v200_v5  ;;  %v202_v12 = vsub.f32 1.0, %v464_v7  ;;  %v218_v13 = vadd.f32 1.0, %v464_v7 }
  0x57   : > { %247 = vst [vmem:[%s737_s18 + $0x60] sm:$0xff] %v231_v8  ;;  %v233_v14 = vmul.f32 %v217_v10, %v201_v9 }
  0x58   : > { %248 = vst [vmem:[%s737_s18 + $0x68] sm:$0xff] %v232_v11  ;;  %v234_v15 = vmul.f32 %v218_v13, %v202_v12 }
  0x59   : > { %249 = vst [vmem:[%s737_s18 + $0x70] sm:$0xff] %v233_v14 }
  0x5a   : > { %250 = vst [vmem:[%s737_s18 + $0x78] sm:$0xff] %v234_v15 }
  0x5b   : > { %508 = shalt.err (!%p505_p3)
}
  0x5c   : > { %s509_s22 = scalar_lea.hbm %s756_s2, 2048  ;;  %s513_s25 = scalar_lea.hbm %s812_s1, 4096 }
  0x5d   : > { %p510_p4 = scmp.ne.s32.totalorder %s756_s2, %s509_s22  ;;  %p514_p12 = scmp.lt.u32.totalorder %s756_s2, %s812_s1 }
  0x5e   : > { %p515_p2 = scmp.lt.u32.totalorder %s513_s25, %s509_s22  ;;  %p517_p8 = scmp.lt.u32.totalorder %s509_s22, %s756_s2 }
  0x5f   : > { %p511_p6 = pnand %p510_p4, %p819_p9 }
  0x60   : > { %p516_p5 = por %p515_p2, %p514_p12 }
  0x61   : > { %p512_p7 = pneg %p511_p6 }
  0x62   : > { %p518_p11 = por %p517_p8, %p516_p5 }
  0x64   : > { %p519_p0 = pnand %p518_p11, %p512_p7 }
  0x66   : > { %522 = shalt.err (!%p519_p0)
}
  0x67   : > { %s584_s4 = smov 128   ;;  %s585_s5 = smov 256  }
  0x68   : > { %s586_s18 = smov 8  }
  0x69   : > { %367 = dma.vmem_to_hbm [thread:$0]  (%p819_p9), %s759_s29, 2048, %s756_s2, %s252_s12, %s584_s4, %s585_s5, %s586_s18  }
  0x6a PF: > { %s282_s27 = sand.u32 1, %s557_s6   ;;  %p820_p10 = scmp.ne.s32.totalorder %s817_s21, 0 }
  0x6b   : > { %p821_p13 = scmp.ge.s32.totalorder %s577_s11, 2  ;;  %s283_s9 = scalar_lea.sflag [#allocation4], %s282_s27 }
  0x6d   : > { %p374_p1 = pnand %p821_p13, %p820_p10 }
  0x6f   : > { %552 = dma.done.wait (!%p374_p1), %s283_s9, 2048  }
  0x70   : > { %554 = vsyncadd (!%p374_p1), %s283_s9, 4294965248  ;;  %s17_s11 = sadd.s32 1, %s577_s11   ;;  %s822_s6 = smov %s561_s7 }
  0x71   : > { %p14_p3 = scmp.ge.s32.totalorder %s17_s11, 4   ;;  %s823_s7 = smov %s565_s8 }
  0x72   : > { %s824_s8 = smov %s653_s20  ;;  %s825_s9 = smov %s573_s10 }
  0x73   : > { %s826_s10 = smov %s828_s14  ;;  %16 = sbr.rel (!%p14_p3) target bundleno = 6 (0x6), region = 69 }
  0x7a   :  { %288 = vsyncpa [#allocation3], 1 }
  0x7b   :  { %290 = vsyncpa [#allocation3 + $0x1], 1 }
  0x7c   :  { %291 = vsyncpa [#allocation4], 1 }
  0x7d   :  { %293 = vsyncpa [#allocation4 + $0x1], 1 }

</bundles_post_ra>
